<compile_context>
chip_gen: v7x
topology: tpu7x:2x2x1
jax: 0.10.0
libtpu: 0.0.40
codegen_flags: <defaults>
</compile_context>

<pallas_src>
import jax
import jax.numpy as jnp
from jax.experimental import pallas as pl
from jax.experimental.pallas import tpu as pltpu

LANES = 128  # vreg lane width; slab is one lane-dense column of tiles


def _round_up(n, m):
    return ((n + m - 1) // m) * m


def make_mlp_kernel(F, H1, H2, C, offsets):
    """Build the fused MLP kernel with static layer sizes / offsets baked in."""
    assert C == 2, "final softmax is specialized for the 2-class head of Net"
    r1, r2, r3, rb1, rb2, rb3 = offsets

    def kernel(x_ref, p_ref, out_ref):
        x = x_ref[...]                                 # (TB, F)

        # fc1 + relu.  w1 lanes >= H1 and b1 lanes >= H1 are zero, so
        # h1[:, H1:] == 0 exactly.
        w1 = p_ref[r1:r1 + F, :]                       # (F, 128)
        b1 = p_ref[rb1:rb1 + 1, :]                     # (1, 128)
        h1 = jnp.maximum(
            jnp.dot(x, w1, preferred_element_type=jnp.float32) + b1, 0.0)

        # fc2 + relu.  128-row block read: rows >= H1 contract against the
        # zero lanes of h1, contributing nothing.  h2[:, H2:] == 0 exactly.
        w2 = p_ref[r2:r2 + LANES, :]                   # (128, 128)
        b2 = p_ref[rb2:rb2 + 1, :]
        h2 = jnp.maximum(
            jnp.dot(h1, w2, preferred_element_type=jnp.float32) + b2, 0.0)

        # fc3 (only lanes [0, C) are meaningful).
        w3 = p_ref[r3:r3 + LANES, :]                   # (128, 128)
        b3 = p_ref[rb3:rb3 + 1, :]
        logits = jnp.dot(h2, w3, preferred_element_type=jnp.float32) + b3

        # 2-class softmax == sigmoid of the logit difference (row-wise, no
        # cross-lane reductions): p1 = 1/(1+exp(l0-l1)), p0 = 1 - p1.
        d = logits[:, 1:2] - logits[:, 0:1]            # (TB, 1)
        p1 = pl.reciprocal(1.0 + jnp.exp(-d), approx=True)
        out_ref[...] = jnp.concatenate([1.0 - p1, p1], axis=1)  # single store

    return kernel


def pack_params(params):
    """Pack w1/w2/w3/b1/b2/b3 into one (R, 128) f32 slab, 8-row-aligned offsets."""
    w1 = jnp.asarray(params["w1"], jnp.float32)
    w2 = jnp.asarray(params["w2"], jnp.float32)
    w3 = jnp.asarray(params["w3"], jnp.float32)
    b1 = jnp.asarray(params["b1"], jnp.float32).reshape(-1)
    b2 = jnp.asarray(params["b2"], jnp.float32).reshape(-1)
    b3 = jnp.asarray(params["b3"], jnp.float32).reshape(-1)

    F, H1 = w1.shape
    H2 = w2.shape[1]
    C = w3.shape[1]

    r1 = 0
    r2 = _round_up(F, 8)
    r3 = r2 + _round_up(H1, 8)
    rb1 = r3 + _round_up(H2, 8)
    rb2 = rb1 + 8
    rb3 = rb2 + 8
    # Slab must cover the full 128-row block reads for w2/w3.
    R = _round_up(max(rb3 + 8, r2 + LANES, r3 + LANES), 8)

    slab = jnp.zeros((R, LANES), jnp.float32)
    slab = slab.at[r1:r1 + F, :H1].set(w1)
    slab = slab.at[r2:r2 + H1, :H2].set(w2)
    slab = slab.at[r3:r3 + H2, :C].set(w3)
    slab = slab.at[rb1, :H1].set(b1)
    slab = slab.at[rb2, :H2].set(b2)
    slab = slab.at[rb3, :C].set(b3)
    return slab, (F, H1, H2, C), (r1, r2, r3, rb1, rb2, rb3)


def net_forward(x, params, *, batch_block=512):
    """x: (B, F) float32; params: dict of weights (in,out) and biases (1,out)."""
    x = jnp.asarray(x, jnp.float32)
    slab, (F, H1, H2, C), offsets = pack_params(params)
    B = x.shape[0]
    # Batch tile: sublane-aligned, large enough to amortize per-step overhead.
    TB = min(_round_up(B, 8), batch_block)
    grid = (pl.cdiv(B, TB),)

    kernel = make_mlp_kernel(F, H1, H2, C, offsets)
    return pl.pallas_call(
        kernel,
        out_shape=jax.ShapeDtypeStruct((B, C), jnp.float32),
        grid=grid,
        in_specs=[
            pl.BlockSpec((TB, F), lambda i: (i, 0)),        # stream batch rows
            pl.BlockSpec(slab.shape, lambda i: (0, 0)),     # weights stay resident
        ],
        out_specs=pl.BlockSpec((TB, C), lambda i: (i, 0)),
        compiler_params=pltpu.CompilerParams(
            dimension_semantics=("parallel",)),             # v7x: shard over 2 TCs
    )(x, slab)


def init_params(key, in_features, h1=10, h2=10, out=2):
    """Deterministic init mimicking PyTorch Linear default (uniform +-1/sqrt(fan_in))."""
    ks = jax.random.split(key, 6)

    def lin(kw, kb, fan_in, fan_out):
        bound = 1.0 / jnp.sqrt(fan_in)
        w = jax.random.uniform(kw, (fan_in, fan_out), jnp.float32, -bound, bound)
        b = jax.random.uniform(kb, (1, fan_out), jnp.float32, -bound, bound)
        return w, b

    w1, b1 = lin(ks[0], ks[1], in_features, h1)
    w2, b2 = lin(ks[2], ks[3], h1, h2)
    w3, b3 = lin(ks[4], ks[5], h2, out)
    return {"w1": w1, "b1": b1, "w2": w2, "b2": b2, "w3": w3, "b3": b3}


if __name__ == "__main__":
    key = jax.random.PRNGKey(0)
    k_x, k_p = jax.random.split(key)

    # Breast-cancer dataset has 30 features; MinMax-scaled inputs live in [0, 1].
    B, F = 8, 30
    x = jax.random.uniform(k_x, (B, F), jnp.float32, 0.0, 1.0)
    params = init_params(k_p, F)

    out = jax.block_until_ready(net_forward(x, params))

    # Pure-JAX reference forward (standard softmax) for verification.
    h1 = jnp.maximum(x @ params["w1"] + params["b1"], 0.0)
    h2 = jnp.maximum(h1 @ params["w2"] + params["b2"], 0.0)
    ref = jax.nn.softmax(h2 @ params["w3"] + params["b3"], axis=1)

    assert out.shape == (B, 2)
    assert jnp.allclose(jnp.sum(out, axis=1), 1.0, atol=1e-5)
    assert jnp.allclose(out, ref, atol=5e-3)

    print("KERNEL_OK")
</pallas_src>

<mosaic_0001>
module attributes {stable_mosaic.version = 11 : i64} {
  func.func @kernel(%arg0: i32, %arg1: memref<8x30xf32, #tpu.memory_space<vmem>>, %arg2: memref<176x128xf32, #tpu.memory_space<vmem>>, %arg3: memref<8x2xf32, #tpu.memory_space<vmem>>) attributes {dimension_semantics = [#tpu.dimension_semantics<parallel>], iteration_bounds = array<i64: 1>, scalar_prefetch = 0 : i64, scratch_operands = 0 : i64, tpu.core_type = #tpu.core_type<tc>, window_params = [{transform_indices = @transform_0, window_bounds = array<i64: 8, 30>}, {pipeline_mode = #tpu.pipeline_mode<synchronous>, transform_indices = @transform_1, window_bounds = array<i64: 176, 128>}, {transform_indices = @transform_2, window_bounds = array<i64: 8, 2>}]} {
    %c0 = arith.constant 0 : index
    %c0_0 = arith.constant 0 : index
    %0 = vector.load %arg1[%c0, %c0_0] : memref<8x30xf32, #tpu.memory_space<vmem>>, vector<8x30xf32>
    %c0_1 = arith.constant 0 : index
    %c0_2 = arith.constant 0 : index
    %1 = vector.load %arg2[%c0_1, %c0_2] : memref<176x128xf32, #tpu.memory_space<vmem>>, vector<30x128xf32>
    %c64 = arith.constant 64 : index
    %c0_3 = arith.constant 0 : index
    %2 = vector.load %arg2[%c64, %c0_3] : memref<176x128xf32, #tpu.memory_space<vmem>>, vector<1x128xf32>
    %cst = arith.constant dense<0.000000e+00> : vector<8x128xf32>
    %3 = tpu.matmul %0, %1, %cst {dimension_numbers = #tpu.dot_dimension_numbers<[1], [0], [0], [1], [0, 0, 1, 1], [], []>} : vector<8x30xf32>, vector<30x128xf32>, vector<8x128xf32> -> vector<8x128xf32>
    %4 = vector.broadcast %2 : vector<1x128xf32> to vector<8x128xf32>
    %5 = arith.addf %3, %4 : vector<8x128xf32>
    %cst_4 = arith.constant 0.000000e+00 : f32
    %6 = vector.broadcast %cst_4 : f32 to vector<8x128xf32>
    %7 = arith.maximumf %5, %6 : vector<8x128xf32>
    %c32 = arith.constant 32 : index
    %c0_5 = arith.constant 0 : index
    %8 = vector.load %arg2[%c32, %c0_5] : memref<176x128xf32, #tpu.memory_space<vmem>>, vector<128x128xf32>
    %c72 = arith.constant 72 : index
    %c0_6 = arith.constant 0 : index
    %9 = vector.load %arg2[%c72, %c0_6] : memref<176x128xf32, #tpu.memory_space<vmem>>, vector<1x128xf32>
    %cst_7 = arith.constant dense<0.000000e+00> : vector<8x128xf32>
    %10 = tpu.matmul %7, %8, %cst_7 {dimension_numbers = #tpu.dot_dimension_numbers<[1], [0], [0], [1], [0, 0, 1, 1], [], []>} : vector<8x128xf32>, vector<128x128xf32>, vector<8x128xf32> -> vector<8x128xf32>
    %11 = vector.broadcast %9 : vector<1x128xf32> to vector<8x128xf32>
    %12 = arith.addf %10, %11 : vector<8x128xf32>
    %cst_8 = arith.constant 0.000000e+00 : f32
    %13 = vector.broadcast %cst_8 : f32 to vector<8x128xf32>
    %14 = arith.maximumf %12, %13 : vector<8x128xf32>
    %c48 = arith.constant 48 : index
    %c0_9 = arith.constant 0 : index
    %15 = vector.load %arg2[%c48, %c0_9] : memref<176x128xf32, #tpu.memory_space<vmem>>, vector<128x128xf32>
    %c80 = arith.constant 80 : index
    %c0_10 = arith.constant 0 : index
    %16 = vector.load %arg2[%c80, %c0_10] : memref<176x128xf32, #tpu.memory_space<vmem>>, vector<1x128xf32>
    %cst_11 = arith.constant dense<0.000000e+00> : vector<8x128xf32>
    %17 = tpu.matmul %14, %15, %cst_11 {dimension_numbers = #tpu.dot_dimension_numbers<[1], [0], [0], [1], [0, 0, 1, 1], [], []>} : vector<8x128xf32>, vector<128x128xf32>, vector<8x128xf32> -> vector<8x128xf32>
    %18 = vector.broadcast %16 : vector<1x128xf32> to vector<8x128xf32>
    %19 = arith.addf %17, %18 : vector<8x128xf32>
    %20 = vector.extract_strided_slice %19 {offsets = [0, 1], sizes = [8, 1], strides = [1, 1]} : vector<8x128xf32> to vector<8x1xf32>
    %21 = vector.extract_strided_slice %19 {offsets = [0, 0], sizes = [8, 1], strides = [1, 1]} : vector<8x128xf32> to vector<8x1xf32>
    %22 = arith.subf %20, %21 : vector<8x1xf32>
    %cst_12 = arith.constant 0.000000e+00 : f32
    %23 = vector.broadcast %cst_12 : f32 to vector<8x1xf32>
    %24 = arith.subf %23, %22 : vector<8x1xf32>
    %25 = math.exp %24 : vector<8x1xf32>
    %cst_13 = arith.constant 1.000000e+00 : f32
    %26 = vector.broadcast %cst_13 : f32 to vector<8x1xf32>
    %27 = arith.addf %26, %25 : vector<8x1xf32>
    %28 = tpu.reciprocal %27 {approx = true} : vector<8x1xf32> -> vector<8x1xf32>
    %cst_14 = arith.constant 1.000000e+00 : f32
    %29 = vector.broadcast %cst_14 : f32 to vector<8x1xf32>
    %30 = arith.subf %29, %28 : vector<8x1xf32>
    %31 = tpu.concatenate %30, %28 in 1 : vector<8x1xf32>, vector<8x1xf32> -> vector<8x2xf32>
    %c0_15 = arith.constant 0 : index
    %c0_16 = arith.constant 0 : index
    %32 = vector.load %arg3[%c0_15, %c0_16] : memref<8x2xf32, #tpu.memory_space<vmem>>, vector<8x2xf32>
    tpu.vector_store %arg3[%c0_15, %c0_16], %31 {strides = array<i32>} : memref<8x2xf32, #tpu.memory_space<vmem>>, vector<8x2xf32>,
    return
  }
  func.func @transform_0(%arg0: i32) -> (i32, i32) {
    %c0_i32 = arith.constant 0 : i32
    %c0_i32_0 = arith.constant 0 : i32
    return %arg0, %c0_i32 : i32, i32
  }
  func.func @transform_1(%arg0: i32) -> (i32, i32) {
    %c0_i32 = arith.constant 0 : i32
    %c0_i32_0 = arith.constant 0 : i32
    %c0_i32_1 = arith.constant 0 : i32
    return %c0_i32, %c0_i32_0 : i32, i32
  }
  func.func @transform_2(%arg0: i32) -> (i32, i32) {
    %c0_i32 = arith.constant 0 : i32
    %c0_i32_0 = arith.constant 0 : i32
    return %arg0, %c0_i32 : i32, i32
  }
}

</mosaic_0001>

<bundles_post_ra>
// kernel: tpu_custom_call.1
= control target key start
LH: loop header
LB: loop body
LE: loop exit
PB: predicated region body
PF: predicated region fallthrough
CT: control target
= control target key end

     0   :  { %7 = vsyncpa [#allocation3], 0  ;;  %s656_s0 = inlined_call_operand.hbm [shape: f32[8,30], index: 0, kind: input, shape index: {}]   ;;  %s657_s1 = inlined_call_operand.hbm [shape: f32[176,128], index: 1, kind: input, shape index: {}]   ;;  %s658_s2 = inlined_call_operand.vmem [shape: f32[8,2], index: 2, kind: output, shape index: {}]  }
   0x1   :  { %8 = vsyncpa [#allocation5], 0  ;;  %s576_s9 = smov [#allocation2]   ;;  %s577_s11 = smov [#allocation4]  }
   0x2   :  { %s15_s10 = sshll.u32 %s576_s9, 4  ;;  %s24_s12 = sshll.u32 %s577_s11, 4  ;;  %s16_s10 = int_to_ptr.vmem [resolvable:$true] %s15_s10  ;;  %s601_s12 = int_to_ptr.vmem [resolvable:$true] %s24_s12 }
   0x3   :  { %s528_s15 = scalar_lea.hbm %s656_s0, 128 }
   0x4   :  { %p529_p0 = scmp.ne.s32.totalorder %s656_s0, %s528_s15  ;;  %p532_p1 = scmp.lt.u32.totalorder %s528_s15, %s656_s0 }
   0x6   :  { %p534_p2 = pnand %p532_p1, %p529_p0 }
   0x8   :  { %537 = shalt.err (!%p534_p2)
}
   0x9   :  { %s538_s20 = scalar_lea.vmem %s16_s10, 128  ;;  %p543_p4 = scmp.lt.s32.totalorder %s16_s10, %s16_s10 }
   0xa   :  { %p539_p3 = scmp.ne.s32.totalorder %s16_s10, %s538_s20  ;;  %p544_p5 = scmp.lt.s32.totalorder %s538_s20, %s538_s20 }
   0xc   :  { %p545_p6 = por %p544_p5, %p543_p4 }
   0xe   :  { %p546_p7 = pnand %p545_p6, %p539_p3 }
  0x10   :  { %549 = shalt.err (!%p546_p7)
}
  0x11   :  { %18 = dma.hbm_to_vmem [thread:$0]  %s656_s0, 128, %s16_s10, [#allocation3]  }
  0x12   :  { %s550_s25 = scalar_lea.hbm %s657_s1, 2816 }
  0x13   :  { %p551_p8 = scmp.ne.s32.totalorder %s657_s1, %s550_s25  ;;  %p554_p9 = scmp.lt.u32.totalorder %s550_s25, %s657_s1 }
  0x15   :  { %p556_p10 = pnand %p554_p9, %p551_p8 }
  0x17   :  { %559 = shalt.err (!%p556_p10)
}
  0x18   :  { %s560_s30 = scalar_lea.vmem %s601_s12, 2816  ;;  %p565_p12 = scmp.lt.s32.totalorder %s601_s12, %s601_s12 }
  0x19   :  { %p561_p11 = scmp.ne.s32.totalorder %s601_s12, %s560_s30  ;;  %p566_p13 = scmp.lt.s32.totalorder %s560_s30, %s560_s30 }
  0x1b   :  { %p567_p0 = por %p566_p13, %p565_p12 }
  0x1d   :  { %p568_p1 = pnand %p567_p0, %p561_p11 }
  0x1f   :  { %571 = shalt.err (!%p568_p1)
}
  0x20   :  { %s578_s0 = smov 128   ;;  %s579_s3 = smov 8  }
  0x21   :  { %30 = dma.hbm_to_vmem [thread:$0]  %s657_s1, 2816, %s601_s12, [#allocation5], %s578_s0, %s578_s0, %s579_s3  }
  0x22   :  { %572 = dma.done.wait [#allocation3], 128  }
  0x23   :  { %573 = vsyncadd [#allocation3], 4294967168 }
  0x24   :  { %574 = dma.done.wait [#allocation5], 2816  }
  0x25   :  { %575 = vsyncadd [#allocation5], 4294964480  ;;  %v580_v0 = vmov 0.0|0.0   ;;  %vm581_vm0 = vmmov 0   ;;  %v582_v1 = vmov 0.0   ;;  %v38_v2 = vld [vmem:[#allocation4] sm:$0xff] }
  0x26   :  { %459 = vmatprep.subr.bf16.mxu0 %v580_v0  ;;  %466 = vmatprep.subr.bf16.mxu1 %v580_v0  ;;  %v39_v3 = vld [vmem:[#allocation4 + $0x8] sm:$0xff]  ;;  %v40_v4 = vld [vmem:[#allocation4 + $0x10] sm:$0xff]  ;;  %v41_v6 = vld [vmem:[#allocation4 + $0x18] sm:$0x3f]  ;;  %vm51_vm1 = vcmask 1045504   ;;  %vm583_vm2 = vmmov 1  }
  0x27   :  { %386 = vmatprep.mubr.msk.f32.mxu0 %vm581_vm0, %v582_v1  ;;  %421 = vmatprep.mubr.msk.f32.mxu1 %vm581_vm0, %v582_v1  ;;  %v460_v5 = vpack.c.bf16 %v39_v3, %v38_v2  ;;  %v126_v7 = vld [vmem:[#allocation4 + $0x20] sm:$0xff]  ;;  %v127_v8 = vld [vmem:[#allocation4 + $0x28] sm:$0xff]  ;;  %v128_v9 = vld [vmem:[#allocation4 + $0x30] sm:$0xff]  ;;  %v463_v11 = vpack.c.bf16 %v41_v6, %v40_v4  ;;  %vm47_vm4 = vcmask 244736   ;;  %s584_s1 = smov 1   ;;  %s585_s6 = smov 127  }
  0x28   :  { %v129_v10 = vld [vmem:[#allocation4 + $0x38] sm:$0xff]  ;;  %v467_v12 = vpack.c.bf16 %v127_v8, %v126_v7  ;;  %vm464_vm3 = vmpackc.low %vm51_vm1, %vm583_vm2  ;;  %v130_v14 = vld [vmem:[#allocation4 + $0x40] sm:$0xff]  ;;  %vm324_vm5 = vcmask 7168   ;;  %vm326_vm6 = vcmask 15360  }
  0x29   :  { %461 = vmatpush3.bf16.msra.mxu0 %v460_v5  ;;  %v470_v13 = vpack.c.bf16 %v129_v10, %v128_v9  ;;  %v131_v15 = vld [vmem:[#allocation4 + $0x48] sm:$0xff]  ;;  %v37_v16 = vld [vmem:[#allocation2] sm:$0xff]  ;;  %v132_v18 = vld [vmem:[#allocation4 + $0x50] sm:$0xff] }
  0x2a   :  { %462 = vmatprep.subr.bf16.mxu0 %v580_v0  ;;  %468 = vmatpush3.bf16.msra.mxu1 %v467_v12  ;;  %v473_v17 = vpack.c.bf16 %v131_v15, %v130_v14  ;;  %v133_v19 = vld [vmem:[#allocation4 + $0x58] sm:$0xff]  ;;  %v134_v21 = vld [vmem:[#allocation4 + $0x60] sm:$0xff]  ;;  %v135_v22 = vld [vmem:[#allocation4 + $0x68] sm:$0xff] }
  0x2b   :  { %469 = vmatprep.subr.bf16.mxu1 %v580_v0  ;;  %v476_v20 = vpack.c.bf16 %v133_v19, %v132_v18  ;;  %v479_v23 = vpack.c.bf16 %v135_v22, %v134_v21  ;;  %v136_v24 = vld [vmem:[#allocation4 + $0x70] sm:$0xff]  ;;  %v137_v25 = vld [vmem:[#allocation4 + $0x78] sm:$0xff]  ;;  %v138_v27 = vld [vmem:[#allocation4 + $0x80] sm:$0xff] }
  0x2c   :  { %v482_v26 = vpack.c.bf16 %v137_v25, %v136_v24  ;;  %v139_v28 = vld [vmem:[#allocation4 + $0x88] sm:$0xff]  ;;  %v140_v30 = vld [vmem:[#allocation4 + $0x90] sm:$0xff]  ;;  %v141_v31 = vld [vmem:[#allocation4 + $0x98] sm:$0xff] }
  0x2d   :  { %465 = vmatpush3.bf16.msk.msra.mxu0 %vm464_vm3, %v463_v11  ;;  %v485_v29 = vpack.c.bf16 %v139_v28, %v138_v27  ;;  %v488_v32 = vpack.c.bf16 %v141_v31, %v140_v30  ;;  %v334_v33 = vld [vmem:[#allocation4 + $0x40] ss:$0 sm:$0xff]  ;;  %v233_v39 = vld [vmem:[#allocation4 + $0xa8] sm:$0xff]  ;;  %v338_v46 = vld [vmem:[#allocation4 + $0x50] ss:$0 sm:$0xff] }
  0x2e   :  { %490 = vmatprep.subr.bf16.mxu0 %v580_v0  ;;  %471 = vmatpush3.bf16.msra.mxu1 %v470_v13  ;;  %v232_v38 = vld [vmem:[#allocation4 + $0xa0] sm:$0xff]  ;;  %v337_v41 = vld [vmem:[#allocation4 + $0x48] ss:$0 sm:$0xff] }
  0x2f   :  { %472 = vmatprep.subr.bf16.mxu1 %v580_v0  ;;  %v512_v40 = vpack.c.bf16 %v233_v39, %v232_v38 }
  0x30   :  { %387 = vmatmul.mubr.msk.f32.vlgmr.msra.gmra.mrb[0].mxu0 %vm47_vm4, %v37_v16 }
  0x31   :  { %492 = vmatpush3.bf16.msra.mxu0 %v470_v13  ;;  %456 = vmatprep.mubr.msk.f32.mxu0 %vm581_vm0, %v582_v1 }
  0x32   :  { %493 = vmatprep.subr.bf16.mxu0 %v580_v0  ;;  %474 = vmatpush3.bf16.msra.mxu1 %v473_v17 }
  0x33   :  { %475 = vmatprep.subr.bf16.mxu1 %v580_v0 }
  0x35   :  { %495 = vmatpush3.bf16.msra.mxu0 %v473_v17 }
  0x36   :  { %496 = vmatprep.subr.bf16.mxu0 %v580_v0  ;;  %477 = vmatpush3.bf16.msra.mxu1 %v476_v20 }
  0x37   :  { %478 = vmatprep.subr.bf16.mxu1 %v580_v0 }
  0x39   :  { %498 = vmatpush3.bf16.msra.mxu0 %v476_v20 }
  0x3a   :  { %499 = vmatprep.subr.bf16.mxu0 %v580_v0  ;;  %480 = vmatpush3.bf16.msra.mxu1 %v479_v23 }
  0x3b   :  { %481 = vmatprep.subr.bf16.mxu1 %v580_v0 }
  0x3d   :  { %501 = vmatpush3.bf16.msra.mxu0 %v479_v23 }
  0x3e   :  { %502 = vmatprep.subr.bf16.mxu0 %v580_v0  ;;  %483 = vmatpush3.bf16.msra.mxu1 %v482_v26 }
  0x3f   :  { %484 = vmatprep.subr.bf16.mxu1 %v580_v0 }
  0x41   :  { %504 = vmatpush3.bf16.msra.mxu0 %v482_v26 }
  0x42   :  { %505 = vmatprep.subr.bf16.mxu0 %v580_v0  ;;  %486 = vmatpush3.bf16.msra.mxu1 %v485_v29 }
  0x43   :  { %487 = vmatprep.subr.bf16.mxu1 %v580_v0 }
  0x45   :  { %507 = vmatpush3.bf16.msra.mxu0 %v485_v29 }
  0x46   :  { %508 = vmatprep.subr.bf16.mxu0 %v580_v0  ;;  %489 = vmatpush3.bf16.msra.mxu1 %v488_v32 }
  0x49   :  { %510 = vmatpush3.bf16.msra.mxu0 %v488_v32 }
  0x4a   :  { %511 = vmatprep.subr.bf16.mxu0 %v580_v0 }
  0x4d   :  { %513 = vmatpush3.bf16.msra.mxu0 %v512_v40 }
 0x103   :  { %v121_v34 = vpop.f32.mrb[0].mxu0 }
 0x104   :  { %v122_v35 = vadd.f32 %v334_v33, %v121_v34  ;;  %v388_v36 = vpop.f32.mrb[1].mxu0 }
 0x106   :  { %v125_v37 = vmax.f32 %v122_v35, 0.0 }
 0x108   :  { %422 = vmatmul.mubr.f32.vlgmr.msra.gmra.mrb[0].mxu1 %v125_v37 }
 0x1db   :  { %v213_v42 = vpop.f32.mrb[0].mxu1 }
 0x1dc   :  { %v214_v43 = vadd.f32 %v337_v41, %v213_v42  ;;  %v423_v44 = vpop.f32.mrb[1].mxu1 }
 0x1de   :  { %v217_v45 = vmax.f32 %v214_v43, 0.0 }
 0x1e0   :  { %457 = vmatmul.mubr.f32.vlgmr.msra.gmra.mrb[2].mxu0 %v217_v45 }
 0x2b3   :  { %v305_v47 = vpop.f32.mrb[2].mxu0 }
 0x2b4   :  { %v306_v48 = vadd.f32 %v338_v46, %v305_v47  ;;  %v458_v49 = vpop.f32.mrb[3].mxu0 }
 0x2b6   :  { %310 = vrot.lane.b32.xlu0 %v306_v48, %s584_s1 }
 0x328   :  { %v311_v50 = vpop.permute.xlu0 %310 }
 0x329   :  { %v313_v51 = vsub.f32 %v306_v48, %v311_v50 }
 0x32b   :  { %v314_v52 = vsub.f32 0.0, %v313_v51 }
 0x32d   :  { %v315_v53 = vmul.f32 1.442695, %v314_v52 }
 0x32f   :  { %524 = vpow2.f32 %v315_v53 }
 0x339   :  { %v525_v54 = vpop.eup %524 }
 0x33a   :  { %v317_v55 = vadd.f32 1.0, %v525_v54 }
 0x33c   :  { %526 = vrcp.f32 %v317_v55 }
 0x346   :  { %v527_v56 = vpop.eup %526 }
 0x347   :  { %v319_v57 = vsub.f32 1.0, %v527_v56 }
 0x349   :  { %321 = vrot.lane.b32.xlu0 %v319_v57, %s585_s6 }
 0x3bb   :  { %v322_v58 = vpop.permute.xlu0 %321 }
 0x3bc   :  { %v325_v59 = vsel %vm324_vm5, %v322_v58, %v527_v56 }
 0x3bd   :  { %327 = vst.msk [vmem:[%s658_s2] sm:$0xff] %vm326_vm6, %v325_v59 }
 0x3be   :  { %332 = vsyncpa [#allocation3], 1 }
 0x3bf   :  { %333 = vsyncpa [#allocation5], 1 }

</bundles_post_ra>
